<compile_context>
chip_gen: v6e
topology: v6e:2x2x1
jax: 0.10.0
libtpu: 0.0.40
codegen_flags: <defaults>
</compile_context>

<pallas_src>
import functools

import numpy as np
import jax
import jax.numpy as jnp
from jax.experimental import pallas as pl
from jax.experimental.pallas import tpu as pltpu


# ----------------------------------------------------------------------------
# 3GPP 38.211 Sec 5.2.1 pseudo-random (Gold) sequence -- vectorized numpy setup
# ----------------------------------------------------------------------------
def generate_prng_seq(length, c_init):
    """Gold sequence c(n) of `length` bits for given c_init (float32 0/1)."""
    nc = 1600
    total = nc + length + 31
    x1 = np.zeros(total, dtype=np.uint8)
    x2 = np.zeros(total, dtype=np.uint8)
    x1[0] = 1
    for i in range(31):
        x2[i] = (c_init >> i) & 1
    # Blocked recurrence: for a block of B<=28 outputs at [n+31, n+31+B) every
    # source index (<= n+B+2 <= n+30) is already computed -> safe vectorization.
    B = 28
    n = 0
    n_steps = nc + length
    while n < n_steps:
        m = min(B, n_steps - n)
        x1[n + 31:n + 31 + m] = x1[n + 3:n + 3 + m] ^ x1[n:n + m]
        x2[n + 31:n + 31 + m] = (x2[n + 3:n + 3 + m] ^ x2[n + 2:n + 2 + m]
                                 ^ x2[n + 1:n + 1 + m] ^ x2[n:n + m])
        n += m
    c = x1[nc:nc + length] ^ x2[nc:nc + length]
    return c.astype(np.float32)


# ----------------------------------------------------------------------------
# Pallas kernels: pure elementwise, memory-bound
# ----------------------------------------------------------------------------
def _binary_kernel(x_ref, seq_ref, o_ref):
    # bit flip: |x - c|  (== XOR for x in {0,1}); seq broadcasts over rows when
    # it has a single sublane, or matches x block-for-block otherwise.
    o_ref[...] = jnp.abs(x_ref[...] - seq_ref[...])


def _llr_kernel(x_ref, sgn_ref, o_ref):
    # sign flip: x * (1 - 2c); bipolar sequence is precomputed at setup.
    o_ref[...] = x_ref[...] * sgn_ref[...]


def _round_up(a, b):
    return ((a + b - 1) // b) * b


def _sublane_min(itemsize):
    # dtype-aware minimum sublane tile (f32/i32: 8, bf16/f16: 16, int8/fp8: 32)
    if itemsize >= 4:
        return 8
    if itemsize == 2:
        return 16
    return 32


def _choose_tiles(rows, n, itemsize, target_block_bytes):
    sub_min = _sublane_min(itemsize)

    # Row tile: full extent when rows is small (legal, avoids dead sublanes in
    # the DMA); otherwise a multiple of sub_min.
    if rows <= sub_min:
        tile_r = rows
    else:
        tile_r = sub_min

    # VMEM footprint of a block rounds the sublane dim up to sub_min.
    r_eff = max(_round_up(max(tile_r, 1), sub_min), sub_min)

    # Lane tile: as many lanes as fit in ~target_block_bytes (multiple of 128),
    # capped by the (128-rounded) problem width -> lane-dense unmasked stores.
    if n <= 128:
        tile_n = n
    else:
        max_lanes = max(128, (target_block_bytes // (r_eff * itemsize)) // 128 * 128)
        tile_n = min(_round_up(n, 128), max_lanes)

    # If lanes are exhausted and there are many rows, grow the row tile instead.
    if tile_n >= n and rows > sub_min:
        max_r = max(sub_min,
                    (target_block_bytes // (max(tile_n, 128) * itemsize))
                    // sub_min * sub_min)
        tile_r = min(_round_up(rows, sub_min), max_r)

    # v7x megacore: ensure mid-size problems produce >= 2 parallel blocks so
    # both TensorCores are active (neutral on single-TC v5e/v6e).
    grid_r = -(-rows // tile_r)
    grid_n = -(-n // tile_n)
    if grid_r * grid_n == 1 and rows * n * itemsize >= (256 << 10):
        if n > 256:
            tile_n = _round_up(-(-n // 2), 128)
        elif rows > 2 * sub_min:
            tile_r = _round_up(-(-rows // 2), sub_min)

    return tile_r, tile_n, sub_min


@functools.partial(jax.jit,
                   static_argnames=("binary", "target_block_bytes", "donate_x"))
def tb5g_scramble(x, seq, binary=True,
                  target_block_bytes=6 * 1024 * 1024,
                  donate_x=False):
    """Apply the TB5GScrambler forward pass.

    x:   float array [..., n]
    seq: [n] scrambling sequence (0/1 for binary mode, +/-1 for LLR mode).
    """
    orig_shape = x.shape
    n = int(orig_shape[-1])
    x2d = x.reshape(-1, n)
    rows = int(x2d.shape[0])
    itemsize = int(np.dtype(x2d.dtype).itemsize)

    # Single-stream long codeword: fold into a dense (n/L, L) 2-D view so the
    # sublane dimension is fully occupied (no metadata cost: contiguous reshape).
    seq_follows_x = False
    if rows == 1 and n >= 8 * 128 and n % 128 == 0:
        L = 0
        max_l = min(8192, n // 8)
        for cand in range(max_l - (max_l % 128), 127, -128):
            if n % cand == 0:
                L = cand
                break
        if L:
            x2d = x2d.reshape(n // L, L)
            seq2d = seq.reshape(n // L, L).astype(x2d.dtype)
            seq_follows_x = True
            rows, n = int(x2d.shape[0]), int(x2d.shape[1])
    if not seq_follows_x:
        seq2d = seq.reshape(1, n).astype(x2d.dtype)

    tile_r, tile_n, sub_min = _choose_tiles(rows, n, itemsize, target_block_bytes)
    grid = (pl.cdiv(rows, tile_r), pl.cdiv(n, tile_n))

    # VMEM budget: 2 double-buffered data blocks (x, out) + seq buffers + slack,
    # with the sublane dimension rounded up to the layout minimum.  Capped so a
    # user-raised target stays under v7x's 64 MiB physical VMEM.
    r_eff = max(_round_up(tile_r, sub_min), sub_min)
    n_eff = max(_round_up(tile_n, 128), 128)
    block_vmem = r_eff * n_eff * itemsize
    seq_rows = tile_r if seq_follows_x else 1
    seq_vmem = max(_round_up(seq_rows, sub_min), sub_min) * n_eff * itemsize
    vmem_limit = 4 * block_vmem + 2 * seq_vmem + (2 << 20)
    vmem_limit = int(max(8 << 20, min(vmem_limit, 56 << 20)))

    if seq_follows_x:
        seq_spec = pl.BlockSpec((tile_r, tile_n), lambda i, j: (i, j))
    else:
        seq_spec = pl.BlockSpec((1, tile_n), lambda i, j: (0, j))

    kernel = _binary_kernel if binary else _llr_kernel

    out2d = pl.pallas_call(
        kernel,
        out_shape=jax.ShapeDtypeStruct((rows, n), x2d.dtype),
        grid=grid,
        in_specs=[
            pl.BlockSpec((tile_r, tile_n), lambda i, j: (i, j)),
            seq_spec,
        ],
        out_specs=pl.BlockSpec((tile_r, tile_n), lambda i, j: (i, j)),
        compiler_params=pltpu.CompilerParams(
            dimension_semantics=("parallel", "parallel"),
            vmem_limit_bytes=vmem_limit),
        input_output_aliases=({0: 0} if donate_x else {}),
    )(x2d, seq2d)

    return out2d.reshape(orig_shape)


# ----------------------------------------------------------------------------
# Module-equivalent wrapper (single stream: scalar n_rnti/n_id)
# ----------------------------------------------------------------------------
class TB5GScramblerPallas:
    def __init__(self, n_rnti=1, n_id=1, binary=True, channel_type="PUSCH",
                 codeword_index=0):
        assert channel_type in ("PUSCH", "PDSCH")
        assert codeword_index in (0, 1)
        assert 0 <= n_rnti < 2 ** 16 and 0 <= n_id < 2 ** 10
        if channel_type == "PUSCH":
            self._c_init = n_rnti * 2 ** 15 + n_id
        else:
            self._c_init = n_rnti * 2 ** 15 + codeword_index * 2 ** 14 + n_id
        self._binary = binary
        self._seq = None
        self._seq_bipol = None
        self._seq_len = None
        # TODO(synk): multi-stream (list n_rnti/n_id) variant not implemented;
        # it only changes the sequence setup (one row per stream), not the kernel.

    def __call__(self, x, binary=None):
        is_binary = self._binary if binary is None else binary
        n = x.shape[-1]
        if self._seq_len != n:
            c = generate_prng_seq(n, self._c_init)
            self._seq = jnp.asarray(c)                    # 0/1 sequence
            self._seq_bipol = jnp.asarray(1.0 - 2.0 * c)  # +/-1 sequence
            self._seq_len = n
        if is_binary:
            return tb5g_scramble(x, self._seq, binary=True)
        return tb5g_scramble(x, self._seq_bipol, binary=False)


if __name__ == "__main__":
    key = jax.random.PRNGKey(0)
    c_init = 1 * 2 ** 15 + 1

    # x: [batch=2, streams=4, n=128]  (arbitrary leading dims, last dim = n)
    x_bits = jax.random.bernoulli(key, 0.5, (2, 4, 128)).astype(jnp.float32)
    scrambler = TB5GScramblerPallas(n_rnti=1, n_id=1, binary=True,
                                    channel_type="PUSCH")

    # binary (bit-flip) mode
    y = jax.block_until_ready(scrambler(x_bits))

    # LLR (sign-flip) mode, overriding binary at call time
    x_llr = jax.random.normal(jax.random.PRNGKey(1), (2, 4, 128), dtype=jnp.float32)
    y_llr = jax.block_until_ready(scrambler(x_llr, binary=False))

    # reference check in plain JAX
    seq = jnp.asarray(generate_prng_seq(128, c_init))
    ref_bin = jnp.abs(x_bits - seq.reshape(1, 1, -1))
    ref_llr = x_llr * (-2.0 * seq.reshape(1, 1, -1) + 1.0)
    assert jnp.allclose(y, ref_bin)
    assert jnp.allclose(y_llr, ref_llr)

    # descrambling (apply twice) recovers the original bits
    x_back = jax.block_until_ready(scrambler(y))
    assert jnp.allclose(x_back, x_bits)

    # non-tile-aligned shape: exercises ragged edge blocks (no pad / slice)
    x_odd = jax.random.bernoulli(jax.random.PRNGKey(2), 0.5, (3, 200)).astype(jnp.float32)
    seq_odd = jnp.asarray(generate_prng_seq(200, c_init))
    scr_odd = TB5GScramblerPallas(n_rnti=1, n_id=1, binary=True)
    y_odd = jax.block_until_ready(scr_odd(x_odd))
    assert jnp.allclose(y_odd, jnp.abs(x_odd - seq_odd.reshape(1, -1)))

    # single-stream long codeword: exercises the dense (n/L, L) fold path
    x_long = jax.random.bernoulli(jax.random.PRNGKey(3), 0.5, (1, 8192)).astype(jnp.float32)
    seq_long = jnp.asarray(generate_prng_seq(8192, c_init))
    scr_long = TB5GScramblerPallas(n_rnti=1, n_id=1, binary=True)
    y_long = jax.block_until_ready(scr_long(x_long))
    assert jnp.allclose(y_long, jnp.abs(x_long - seq_long.reshape(1, -1)))

    # bf16 LLR input: exercises the dtype-aware sublane-tile minimum
    x_bf16 = jax.random.normal(jax.random.PRNGKey(4), (20, 300), dtype=jnp.float32).astype(jnp.bfloat16)
    seq_b = jnp.asarray(generate_prng_seq(300, c_init))
    scr_b = TB5GScramblerPallas(n_rnti=1, n_id=1, binary=False)
    y_b = jax.block_until_ready(scr_b(x_bf16))
    ref_b = x_bf16 * (-2.0 * seq_b.reshape(1, -1) + 1.0).astype(jnp.bfloat16)
    assert jnp.allclose(y_b.astype(jnp.float32), ref_b.astype(jnp.float32))

    print("KERNEL_OK")
</pallas_src>

<mosaic_0001>
module attributes {stable_mosaic.version = 11 : i64} {
  func.func @_binary_kernel(%arg0: i32, %arg1: i32, %arg2: memref<8x128xf32, #tpu.memory_space<vmem>>, %arg3: memref<1x128xf32, #tpu.memory_space<vmem>>, %arg4: memref<8x128xf32, #tpu.memory_space<vmem>>) attributes {dimension_semantics = [#tpu.dimension_semantics<parallel>, #tpu.dimension_semantics<parallel>], iteration_bounds = array<i64: 1, 1>, scalar_prefetch = 0 : i64, scratch_operands = 0 : i64, tpu.core_type = #tpu.core_type<tc>, window_params = [{transform_indices = @transform_0, window_bounds = array<i64: 8, 128>}, {transform_indices = @transform_1, window_bounds = array<i64: 1, 128>}, {transform_indices = @transform_2, window_bounds = array<i64: 8, 128>}]} {
    %c0 = arith.constant 0 : index
    %c0_0 = arith.constant 0 : index
    %0 = vector.load %arg2[%c0, %c0_0] : memref<8x128xf32, #tpu.memory_space<vmem>>, vector<8x128xf32>
    %c0_1 = arith.constant 0 : index
    %c0_2 = arith.constant 0 : index
    %1 = vector.load %arg3[%c0_1, %c0_2] : memref<1x128xf32, #tpu.memory_space<vmem>>, vector<1x128xf32>
    %2 = vector.broadcast %1 : vector<1x128xf32> to vector<8x128xf32>
    %3 = arith.subf %0, %2 : vector<8x128xf32>
    %4 = math.absf %3 : vector<8x128xf32>
    %c0_3 = arith.constant 0 : index
    %c0_4 = arith.constant 0 : index
    %5 = vector.load %arg4[%c0_3, %c0_4] : memref<8x128xf32, #tpu.memory_space<vmem>>, vector<8x128xf32>
    tpu.vector_store %arg4[%c0_3, %c0_4], %4 {strides = array<i32>} : memref<8x128xf32, #tpu.memory_space<vmem>>, vector<8x128xf32>,
    return
  }
  func.func @transform_0(%arg0: i32, %arg1: i32) -> (i32, i32) {
    %c0_i32 = arith.constant 0 : i32
    return %arg0, %arg1 : i32, i32
  }
  func.func @transform_1(%arg0: i32, %arg1: i32) -> (i32, i32) {
    %c0_i32 = arith.constant 0 : i32
    %c0_i32_0 = arith.constant 0 : i32
    return %c0_i32, %arg1 : i32, i32
  }
  func.func @transform_2(%arg0: i32, %arg1: i32) -> (i32, i32) {
    %c0_i32 = arith.constant 0 : i32
    return %arg0, %arg1 : i32, i32
  }
}

</mosaic_0001>

<bundles_post_ra>
// kernel: tb5g_scramble.1
= control target key start
LH: loop header
LB: loop body
LE: loop exit
PB: predicated region body
PF: predicated region fallthrough
CT: control target
= control target key end

     0   :  { %7 = vsyncpa [#allocation3], 0  ;;  %s123_s0 = inlined_call_operand.hbm [shape: f32[8,128], index: 0, kind: input, shape index: {}]   ;;  %s124_s1 = inlined_call_operand.vmem [shape: f32[1,128], index: 1, kind: input, shape index: {}]   ;;  %s125_s2 = inlined_call_operand.hbm [shape: f32[8,128], index: 2, kind: output, shape index: {}]  }
   0x1   :  { %8 = vsyncpa [#allocation4], 0  ;;  %s97_s9 = smov [#allocation2]  }
   0x2   :  { %s15_s10 = sshll.u32 %s97_s9, 4  ;;  %s16_s10 = int_to_ptr.vmem [resolvable:$true] %s15_s10 }
   0x3   :  { %s61_s11 = scalar_lea.vmem %s16_s10, 128  ;;  %p66_p1 = scmp.lt.s32.totalorder %s16_s10, %s16_s10 }
   0x4   :  { %p62_p0 = scmp.ne.s32.totalorder %s16_s10, %s61_s11  ;;  %p67_p2 = scmp.lt.s32.totalorder %s61_s11, %s61_s11 }
   0x6   :  { %p68_p3 = por %p67_p2, %p66_p1 }
   0x8   :  { %p69_p4 = pnand %p68_p3, %p62_p0 }
   0xa   :  { %72 = shalt.err (!%p69_p4)
}
   0xb   :  { %18 = dma.hbm_to_vmem [thread:$0]  %s123_s0, 128, %s16_s10, [#allocation3]  }
   0xc   :  { %93 = dma.done.wait [#allocation3], 128  }
   0xd   :  { %94 = vsyncadd [#allocation3], 4294967168  ;;  %v24_v0 = vld [vmem:[#allocation2] sm:$0xff]  ;;  %s98_s16 = smov [#allocation5]  }
   0xe   :  { %v50_v1 = vld [vmem:[%s124_s1] ss:$0 sm:$0xff]  ;;  %s41_s17 = sshll.u32 %s98_s16, 4  ;;  %s42_s17 = int_to_ptr.vmem [resolvable:$true] %s41_s17 }
   0xf   :  { %v32_v2 = vsub.f32 %v24_v0, %v50_v1  ;;  %s73_s18 = scalar_lea.vmem %s42_s17, 128  ;;  %p78_p6 = scmp.lt.s32.totalorder %s42_s17, %s42_s17 }
  0x10   :  { %p74_p5 = scmp.ne.s32.totalorder %s42_s17, %s73_s18  ;;  %p79_p7 = scmp.lt.s32.totalorder %s73_s18, %s73_s18 }
  0x11   :  { %v33_v3 = vand.u32 2147483647, %v32_v2 }
  0x12   :  { %p80_p8 = por %p79_p7, %p78_p6 }
  0x13   :  { %34 = vst [vmem:[#allocation5] sm:$0xff] %v33_v3 }
  0x14   :  { %p81_p9 = pnand %p80_p8, %p74_p5 }
  0x16   :  { %84 = shalt.err (!%p81_p9)
}
  0x17   :  { %44 = dma.vmem_to_hbm [thread:$0]  %s42_s17, 128, %s125_s2, [#allocation4]  }
  0x18   :  { %95 = dma.done.wait [#allocation4], 128  }
  0x19   :  { %96 = vsyncadd [#allocation4], 4294967168 }
  0x1a   :  { %48 = vsyncpa [#allocation3], 1 }
  0x1b   :  { %49 = vsyncpa [#allocation4], 1 }

</bundles_post_ra>
